<compile_context>
chip_gen: v7x
topology: tpu7x:2x2x1
jax: 0.10.0
libtpu: 0.0.40
codegen_flags: <defaults>
</compile_context>

<pallas_src>
import jax
import jax.numpy as jnp
from jax.experimental import pallas as pl
from jax.experimental.pallas import tpu as pltpu

LANE = 128
_VMEM_BUDGET = 40 * 1024 * 1024   # conservative: fits v7x's 64 MiB physical VMEM


def _silu(x):
    return x * jax.nn.sigmoid(x)


def _round_up(x, m):
    return ((x + m - 1) // m) * m


def _cdiv(a, b):
    return -(-a // b)


# --------------------------------------------------------------------------- #
# Kernel
# --------------------------------------------------------------------------- #
def qnetwork_kernel(
    x_ref,                  # [TB, TK]     f32 flattened-observation tile
    we_ref, be_ref,         # encoder:     [TK, OUTW] bf16, [1, OUTW] f32
    wh_ref, bh_ref,         # hidden:      [OUTW, U]  bf16, [1, U]    f32
    wva1_ref, bva1_ref,     # fused duel hidden: [U, 2U] bf16, [1, 2U] f32
    w2_ref, b2_ref,         # fused duel out:    [2U, OUTW] f32, [1, OUTW] f32
    out_ref,                # [TB, OUTW] f32: cols [0:E]=oe, cols [E:E+A]=Q
    acc_ref,                # scratch [TB, OUTW] f32: encoder K-accumulator
):
    k = pl.program_id(1)

    @pl.when(k == 0)
    def _():
        acc_ref[...] = jnp.zeros_like(acc_ref)

    # Encoder partial matmul over in_dim tiles. x arrives as f32 (HBM carries
    # it only once); the bf16 cast happens here on the VPU, hidden under MXU.
    acc_ref[...] += jnp.dot(x_ref[...].astype(jnp.bfloat16), we_ref[...],
                            preferred_element_type=jnp.float32)

    @pl.when(k == pl.num_programs(1) - 1)
    def _():
        # Encoder output; padded columns (>= E) are exactly zero because the
        # padded weight/bias columns are zero and SiLU(0) == 0.
        oe = _silu(acc_ref[...] + be_ref[...])                    # [TB, OUTW] f32

        h = _silu(jnp.dot(oe.astype(jnp.bfloat16), wh_ref[...],
                          preferred_element_type=jnp.float32) + bh_ref[...])

        z = _silu(jnp.dot(h.astype(jnp.bfloat16), wva1_ref[...],
                          preferred_element_type=jnp.float32) + bva1_ref[...])

        # Fused dueling output matmul (f32 weights -> exact action selection):
        # cols [E:E+A] = V + (A_j - mean(A)) = Q_j, all other cols are zero.
        va = jnp.dot(z, w2_ref[...],
                     preferred_element_type=jnp.float32) + b2_ref[...]

        # oe cols >= E are zero and va cols < E are zero, so one VPU add packs
        # [oe | Q] into a single lane-dense 128-wide slab (one unmasked store).
        out_ref[...] = oe + va


# --------------------------------------------------------------------------- #
# One-time parameter packing (done at parameter-update time, NOT per forward)
# --------------------------------------------------------------------------- #
def pack_params(params):
    (we, be, wh, bh, wv1, bv1, wv2, bv2, wa1, ba1, wa2, ba2) = params
    D, E = we.shape
    U = wh.shape[1]
    A = wa2.shape[1]
    OUTW = _round_up(E + A, LANE)          # lane-dense output slab width

    bf16 = jnp.bfloat16
    we_p = jnp.pad(we, ((0, 0), (0, OUTW - E))).astype(bf16)      # [D, OUTW]
    be_p = jnp.pad(be, ((0, 0), (0, OUTW - E)))                    # [1, OUTW] f32
    wh_p = jnp.pad(wh, ((0, OUTW - E), (0, 0))).astype(bf16)       # [OUTW, U]

    wva1 = jnp.concatenate([wv1, wa1], axis=1).astype(bf16)        # [U, 2U]
    bva1 = jnp.concatenate([bv1, ba1], axis=1)                     # [1, 2U] f32

    # Pre-centered advantage head (exact in f32) + value head folded (broadcast)
    # into the same action columns -> Q comes directly out of the matmul.
    wa2_c = wa2 - jnp.mean(wa2, axis=1, keepdims=True)
    ba2_c = ba2 - jnp.mean(ba2)
    w2 = jnp.zeros((2 * U, OUTW), jnp.float32)
    w2 = w2.at[:U, E:E + A].set(jnp.broadcast_to(wv2, (U, A)))     # value term
    w2 = w2.at[U:, E:E + A].set(wa2_c)                             # centered adv
    b2 = jnp.zeros((1, OUTW), jnp.float32)
    b2 = b2.at[0, E:E + A].set(ba2_c[0] + bv2[0, 0])

    packed = (we_p, be_p, wh_p, bh, wva1, bva1, w2, b2)
    meta = dict(D=D, E=E, U=U, A=A, OUTW=OUTW)
    return packed, meta


# --------------------------------------------------------------------------- #
# Forward wrapper
# --------------------------------------------------------------------------- #
def qnetwork_forward(x_nchw, packed, meta, batch_tile=None):
    """x_nchw: [B, C, H, W] float32. Returns (oe [B, E], q [B, A])."""
    we_p, be_p, wh_p, bh, wva1, bva1, w2, b2 = packed
    D, E, U, A, OUTW = meta["D"], meta["E"], meta["U"], meta["A"], meta["OUTW"]

    B = x_nchw.shape[0]
    x = x_nchw.reshape(B, -1)              # stays f32; contiguous reshape (no copy)
    assert x.shape[1] == D

    # ---- VMEM footprint model (bytes) for the chosen tiling ----
    def vmem_need(tb, tk):
        return (2 * tb * tk * 4                       # x tile, f32, double-buffered
                + 2 * tk * OUTW * 2                   # encoder weight tile, bf16, x2
                + OUTW * U * 2 + 2 * U * U * 2        # wh, wva1 (bf16, single buffer)
                + 2 * U * OUTW * 4                    # w2 (f32, single buffer)
                + (U + 2 * U + 2 * OUTW) * 4          # biases (f32)
                + 2 * tb * OUTW * 4                   # output slab, double-buffered
                + tb * OUTW * 4)                      # encoder accumulator scratch

    # ---- batch tile: one big step up to 256 rows (per-step overhead ~0.35us
    #      dominates below that); above, >=2 steps so both v7x TCs get work ----
    B8 = _round_up(max(B, 1), 8)
    if batch_tile is not None:
        TB = _round_up(batch_tile, 8)
    elif B8 <= 256:
        TB = B8
    else:
        TB = min(512, _round_up(_cdiv(B8, 2), 8))

    # ---- K (in_dim) tile: keep the whole reduction in one step when it fits
    #      the VMEM budget; otherwise pick the largest 128-multiple divisor ----
    def pick_tk(tb):
        if vmem_need(tb, D) <= _VMEM_BUDGET:
            return D
        cands = [t for t in range(LANE, D, LANE) if D % t == 0]
        for t in sorted(cands, reverse=True):
            if vmem_need(tb, t) <= _VMEM_BUDGET:
                return t
        # TODO(synk): if in_dim has no 128-multiple divisor, pad D here.
        return cands[0] if cands else D

    TK = pick_tk(TB)
    while vmem_need(TB, TK) > _VMEM_BUDGET and TB > 8:
        TB = max(8, _round_up(TB // 2, 8))
        TK = pick_tk(TB)

    nb = _cdiv(B8, TB)
    nk = D // TK
    B_pad = nb * TB
    if B_pad != B:
        x = jnp.pad(x, ((0, B_pad - B), (0, 0)))       # at most TB-1 zero rows

    need = vmem_need(TB, TK)
    vmem_limit = int(min(48 * 1024 * 1024,
                         max(int(need * 1.25) + (1 << 20), 16 * 1024 * 1024)))

    resident = pl.Buffered(1)   # constant-index weights: single VMEM buffer

    in_specs = [
        pl.BlockSpec((TB, TK), lambda i, k: (i, k)),                 # x
        pl.BlockSpec((TK, OUTW), lambda i, k: (k, 0)),               # encoder W
        pl.BlockSpec(be_p.shape, lambda i, k: (0, 0), pipeline_mode=resident),
        pl.BlockSpec(wh_p.shape, lambda i, k: (0, 0), pipeline_mode=resident),
        pl.BlockSpec(bh.shape, lambda i, k: (0, 0), pipeline_mode=resident),
        pl.BlockSpec(wva1.shape, lambda i, k: (0, 0), pipeline_mode=resident),
        pl.BlockSpec(bva1.shape, lambda i, k: (0, 0), pipeline_mode=resident),
        pl.BlockSpec(w2.shape, lambda i, k: (0, 0), pipeline_mode=resident),
        pl.BlockSpec(b2.shape, lambda i, k: (0, 0), pipeline_mode=resident),
    ]
    out_specs = pl.BlockSpec((TB, OUTW), lambda i, k: (i, 0))

    flops = 2 * B_pad * (D * OUTW + OUTW * U + U * 2 * U + 2 * U * OUTW)
    transcendentals = B_pad * (OUTW + U + 2 * U)
    bytes_accessed = (
        x.size * 4
        + (we_p.size + wh_p.size + wva1.size) * 2
        + (w2.size + be_p.size + bh.size + bva1.size + b2.size) * 4
        + B_pad * OUTW * 4
    )

    out = pl.pallas_call(
        qnetwork_kernel,
        out_shape=jax.ShapeDtypeStruct((B_pad, OUTW), jnp.float32),
        grid=(nb, nk),
        in_specs=in_specs,
        out_specs=out_specs,
        scratch_shapes=[pltpu.VMEM((TB, OUTW), jnp.float32)],
        compiler_params=pltpu.CompilerParams(
            dimension_semantics=("parallel", "arbitrary"),
            vmem_limit_bytes=vmem_limit),
        cost_estimate=pl.CostEstimate(
            flops=flops, transcendentals=transcendentals,
            bytes_accessed=bytes_accessed),
    )(x, we_p, be_p, wh_p, bh, wva1, bva1, w2, b2)

    oe = out[:B, :E]
    q = out[:B, E:E + A]
    return oe, q


# --------------------------------------------------------------------------- #
# Synthetic params + pure-JAX reference
# --------------------------------------------------------------------------- #
def init_params(key, in_dim, enc_units, units, action_num):
    ks = jax.random.split(key, 6)

    def lin(k, fan_in, fan_out):
        w = jax.random.normal(k, (fan_in, fan_out), jnp.float32) * (1.0 / jnp.sqrt(fan_in))
        b = jnp.zeros((1, fan_out), jnp.float32)
        return w, b

    we, be = lin(ks[0], in_dim, enc_units)        # encoder
    wh, bh = lin(ks[1], enc_units, units)         # hidden_block
    wv1, bv1 = lin(ks[2], units, units)           # value hidden
    wv2, bv2 = lin(ks[3], units, 1)               # value out
    wa1, ba1 = lin(ks[4], units, units)           # advantage hidden
    wa2, ba2 = lin(ks[5], units, action_num)      # advantage out
    return (we, be, wh, bh, wv1, bv1, wv2, bv2, wa1, ba1, wa2, ba2)


def reference_forward(x_nchw, params):
    (we, be, wh, bh, wv1, bv1, wv2, bv2, wa1, ba1, wa2, ba2) = params
    x = x_nchw.reshape(x_nchw.shape[0], -1)
    oe = _silu(x @ we + be)
    h = _silu(oe @ wh + bh)
    v = _silu(h @ wv1 + bv1) @ wv2 + bv2
    a = _silu(h @ wa1 + ba1) @ wa2 + ba2
    q = v + a - a.mean(axis=-1, keepdims=True)
    return oe, q


if __name__ == "__main__":
    key = jax.random.PRNGKey(0)
    k_x, k_p = jax.random.split(key)

    B, C, H, W = 2, 4, 16, 16          # observation_space.shape = (4, 16, 16)
    ENC_UNITS = 32                     # encoder output size
    UNITS = 32                         # hidden / dueling units
    ACTION_NUM = 5

    x = jax.random.normal(k_x, (B, C, H, W), jnp.float32)
    params = init_params(k_p, C * H * W, ENC_UNITS, UNITS, ACTION_NUM)

    packed, meta = pack_params(params)         # one-time packing (param-update time)
    packed = jax.block_until_ready(packed)

    oe, q = qnetwork_forward(x, packed, meta)
    jax.block_until_ready((oe, q))

    oe_ref, q_ref = reference_forward(x, params)
    assert oe.shape == (B, ENC_UNITS) and q.shape == (B, ACTION_NUM)
    # bf16 MXU operands on the big matmuls (f32 accumulation / f32 final head)
    # -> loose tolerance vs. the pure-f32 reference.
    assert jnp.allclose(oe, oe_ref, atol=5e-2, rtol=5e-2)
    assert jnp.allclose(q, q_ref, atol=5e-2, rtol=5e-2)

    print("KERNEL_OK")
</pallas_src>

<mosaic_0001>
module attributes {stable_mosaic.version = 11 : i64} {
  func.func @qnetwork_kernel(%arg0: i32, %arg1: i32, %arg2: memref<8x1024xf32, #tpu.memory_space<vmem>>, %arg3: memref<1024x128xbf16, #tpu.memory_space<vmem>>, %arg4: memref<1x128xf32, #tpu.memory_space<vmem>>, %arg5: memref<128x32xbf16, #tpu.memory_space<vmem>>, %arg6: memref<1x32xf32, #tpu.memory_space<vmem>>, %arg7: memref<32x64xbf16, #tpu.memory_space<vmem>>, %arg8: memref<1x64xf32, #tpu.memory_space<vmem>>, %arg9: memref<64x128xf32, #tpu.memory_space<vmem>>, %arg10: memref<1x128xf32, #tpu.memory_space<vmem>>, %arg11: memref<8x128xf32, #tpu.memory_space<vmem>>, %arg12: memref<8x128xf32, #tpu.memory_space<vmem>>) attributes {dimension_semantics = [#tpu.dimension_semantics<parallel>, #tpu.dimension_semantics<arbitrary>], iteration_bounds = array<i64: 1, 1>, scalar_prefetch = 0 : i64, scratch_operands = 1 : i64, tpu.core_type = #tpu.core_type<tc>, window_params = [{transform_indices = @transform_0, window_bounds = array<i64: 8, 1024>}, {transform_indices = @transform_1, window_bounds = array<i64: 1024, 128>}, {pipeline_mode = #tpu.pipeline_mode<synchronous>, transform_indices = @transform_2, window_bounds = array<i64: 1, 128>}, {pipeline_mode = #tpu.pipeline_mode<synchronous>, transform_indices = @transform_3, window_bounds = array<i64: 128, 32>}, {pipeline_mode = #tpu.pipeline_mode<synchronous>, transform_indices = @transform_4, window_bounds = array<i64: 1, 32>}, {pipeline_mode = #tpu.pipeline_mode<synchronous>, transform_indices = @transform_5, window_bounds = array<i64: 32, 64>}, {pipeline_mode = #tpu.pipeline_mode<synchronous>, transform_indices = @transform_6, window_bounds = array<i64: 1, 64>}, {pipeline_mode = #tpu.pipeline_mode<synchronous>, transform_indices = @transform_7, window_bounds = array<i64: 64, 128>}, {pipeline_mode = #tpu.pipeline_mode<synchronous>, transform_indices = @transform_8, window_bounds = array<i64: 1, 128>}, {transform_indices = @transform_9, window_bounds = array<i64: 8, 128>}]} {
    %c0_i32 = arith.constant 0 : i32
    %0 = arith.cmpi eq, %arg1, %c0_i32 : i32
    %1 = arith.extui %0 : i1 to i32
    %c0_i32_0 = arith.constant 0 : i32
    %2 = arith.cmpi ne, %1, %c0_i32_0 : i32
    scf.if %2 {
      %cst_10 = arith.constant 0.000000e+00 : f32
      %13 = vector.broadcast %cst_10 : f32 to vector<8x128xf32>
      %c0_11 = arith.constant 0 : index
      %c0_12 = arith.constant 0 : index
      %14 = vector.load %arg12[%c0_11, %c0_12] : memref<8x128xf32, #tpu.memory_space<vmem>>, vector<8x128xf32>
      tpu.vector_store %arg12[%c0_11, %c0_12], %13 {strides = array<i32>} : memref<8x128xf32, #tpu.memory_space<vmem>>, vector<8x128xf32>,
    } else {
    }
    %c0 = arith.constant 0 : index
    %c0_1 = arith.constant 0 : index
    %3 = vector.load %arg12[%c0, %c0_1] : memref<8x128xf32, #tpu.memory_space<vmem>>, vector<8x128xf32>
    %c0_2 = arith.constant 0 : index
    %c0_3 = arith.constant 0 : index
    %4 = vector.load %arg2[%c0_2, %c0_3] : memref<8x1024xf32, #tpu.memory_space<vmem>>, vector<8x1024xf32>
    %5 = arith.truncf %4 : vector<8x1024xf32> to vector<8x1024xbf16>
    %c0_4 = arith.constant 0 : index
    %c0_5 = arith.constant 0 : index
    %6 = vector.load %arg3[%c0_4, %c0_5] : memref<1024x128xbf16, #tpu.memory_space<vmem>>, vector<1024x128xbf16>
    %cst = arith.constant dense<0.000000e+00> : vector<8x128xf32>
    %7 = tpu.matmul %5, %6, %cst {dimension_numbers = #tpu.dot_dimension_numbers<[1], [0], [0], [1], [0, 0, 1, 1], [], []>} : vector<8x1024xbf16>, vector<1024x128xbf16>, vector<8x128xf32> -> vector<8x128xf32>
    %8 = arith.addf %3, %7 : vector<8x128xf32>
    %c0_6 = arith.constant 0 : index
    %c0_7 = arith.constant 0 : index
    %9 = vector.load %arg12[%c0_6, %c0_7] : memref<8x128xf32, #tpu.memory_space<vmem>>, vector<8x128xf32>
    tpu.vector_store %arg12[%c0_6, %c0_7], %8 {strides = array<i32>} : memref<8x128xf32, #tpu.memory_space<vmem>>, vector<8x128xf32>,
    %c0_i32_8 = arith.constant 0 : i32
    %10 = arith.cmpi eq, %arg1, %c0_i32_8 : i32
    %11 = arith.extui %10 : i1 to i32
    %c0_i32_9 = arith.constant 0 : i32
    %12 = arith.cmpi ne, %11, %c0_i32_9 : i32
    scf.if %12 {
      %c0_10 = arith.constant 0 : index
      %c0_11 = arith.constant 0 : index
      %13 = vector.load %arg12[%c0_10, %c0_11] : memref<8x128xf32, #tpu.memory_space<vmem>>, vector<8x128xf32>
      %c0_12 = arith.constant 0 : index
      %c0_13 = arith.constant 0 : index
      %14 = vector.load %arg4[%c0_12, %c0_13] : memref<1x128xf32, #tpu.memory_space<vmem>>, vector<1x128xf32>
      %15 = vector.broadcast %14 : vector<1x128xf32> to vector<8x128xf32>
      %16 = arith.addf %13, %15 : vector<8x128xf32>
      %17 = arith.negf %16 : vector<8x128xf32>
      %18 = math.exp %17 : vector<8x128xf32>
      %cst_14 = arith.constant 1.000000e+00 : f32
      %19 = vector.broadcast %cst_14 : f32 to vector<8x128xf32>
      %20 = arith.addf %19, %18 : vector<8x128xf32>
      %21 = arith.divf %19, %20 : vector<8x128xf32>
      %22 = arith.mulf %16, %21 : vector<8x128xf32>
      %23 = arith.truncf %22 : vector<8x128xf32> to vector<8x128xbf16>
      %c0_15 = arith.constant 0 : index
      %c0_16 = arith.constant 0 : index
      %24 = vector.load %arg5[%c0_15, %c0_16] : memref<128x32xbf16, #tpu.memory_space<vmem>>, vector<128x32xbf16>
      %cst_17 = arith.constant dense<0.000000e+00> : vector<8x32xf32>
      %25 = tpu.matmul %23, %24, %cst_17 {dimension_numbers = #tpu.dot_dimension_numbers<[1], [0], [0], [1], [0, 0, 1, 1], [], []>} : vector<8x128xbf16>, vector<128x32xbf16>, vector<8x32xf32> -> vector<8x32xf32>
      %c0_18 = arith.constant 0 : index
      %c0_19 = arith.constant 0 : index
      %26 = vector.load %arg6[%c0_18, %c0_19] : memref<1x32xf32, #tpu.memory_space<vmem>>, vector<1x32xf32>
      %27 = vector.broadcast %26 : vector<1x32xf32> to vector<8x32xf32>
      %28 = arith.addf %25, %27 : vector<8x32xf32>
      %29 = arith.negf %28 : vector<8x32xf32>
      %30 = math.exp %29 : vector<8x32xf32>
      %cst_20 = arith.constant 1.000000e+00 : f32
      %31 = vector.broadcast %cst_20 : f32 to vector<8x32xf32>
      %32 = arith.addf %31, %30 : vector<8x32xf32>
      %33 = arith.divf %31, %32 : vector<8x32xf32>
      %34 = arith.mulf %28, %33 : vector<8x32xf32>
      %35 = arith.truncf %34 : vector<8x32xf32> to vector<8x32xbf16>
      %c0_21 = arith.constant 0 : index
      %c0_22 = arith.constant 0 : index
      %36 = vector.load %arg7[%c0_21, %c0_22] : memref<32x64xbf16, #tpu.memory_space<vmem>>, vector<32x64xbf16>
      %cst_23 = arith.constant dense<0.000000e+00> : vector<8x64xf32>
      %37 = tpu.matmul %35, %36, %cst_23 {dimension_numbers = #tpu.dot_dimension_numbers<[1], [0], [0], [1], [0, 0, 1, 1], [], []>} : vector<8x32xbf16>, vector<32x64xbf16>, vector<8x64xf32> -> vector<8x64xf32>
      %c0_24 = arith.constant 0 : index
      %c0_25 = arith.constant 0 : index
      %38 = vector.load %arg8[%c0_24, %c0_25] : memref<1x64xf32, #tpu.memory_space<vmem>>, vector<1x64xf32>
      %39 = vector.broadcast %38 : vector<1x64xf32> to vector<8x64xf32>
      %40 = arith.addf %37, %39 : vector<8x64xf32>
      %41 = arith.negf %40 : vector<8x64xf32>
      %42 = math.exp %41 : vector<8x64xf32>
      %cst_26 = arith.constant 1.000000e+00 : f32
      %43 = vector.broadcast %cst_26 : f32 to vector<8x64xf32>
      %44 = arith.addf %43, %42 : vector<8x64xf32>
      %45 = arith.divf %43, %44 : vector<8x64xf32>
      %46 = arith.mulf %40, %45 : vector<8x64xf32>
      %c0_27 = arith.constant 0 : index
      %c0_28 = arith.constant 0 : index
      %47 = vector.load %arg9[%c0_27, %c0_28] : memref<64x128xf32, #tpu.memory_space<vmem>>, vector<64x128xf32>
      %cst_29 = arith.constant dense<0.000000e+00> : vector<8x128xf32>
      %48 = tpu.matmul %46, %47, %cst_29 {dimension_numbers = #tpu.dot_dimension_numbers<[1], [0], [0], [1], [0, 0, 1, 1], [], []>} : vector<8x64xf32>, vector<64x128xf32>, vector<8x128xf32> -> vector<8x128xf32>
      %c0_30 = arith.constant 0 : index
      %c0_31 = arith.constant 0 : index
      %49 = vector.load %arg10[%c0_30, %c0_31] : memref<1x128xf32, #tpu.memory_space<vmem>>, vector<1x128xf32>
      %50 = vector.broadcast %49 : vector<1x128xf32> to vector<8x128xf32>
      %51 = arith.addf %48, %50 : vector<8x128xf32>
      %52 = arith.addf %22, %51 : vector<8x128xf32>
      %c0_32 = arith.constant 0 : index
      %c0_33 = arith.constant 0 : index
      %53 = vector.load %arg11[%c0_32, %c0_33] : memref<8x128xf32, #tpu.memory_space<vmem>>, vector<8x128xf32>
      tpu.vector_store %arg11[%c0_32, %c0_33], %52 {strides = array<i32>} : memref<8x128xf32, #tpu.memory_space<vmem>>, vector<8x128xf32>,
    } else {
    }
    return
  }
  func.func @transform_0(%arg0: i32, %arg1: i32) -> (i32, i32) {
    %c0_i32 = arith.constant 0 : i32
    return %arg0, %arg1 : i32, i32
  }
  func.func @transform_1(%arg0: i32, %arg1: i32) -> (i32, i32) {
    %c0_i32 = arith.constant 0 : i32
    %c0_i32_0 = arith.constant 0 : i32
    return %arg1, %c0_i32 : i32, i32
  }
  func.func @transform_2(%arg0: i32, %arg1: i32) -> (i32, i32) {
    %c0_i32 = arith.constant 0 : i32
    %c0_i32_0 = arith.constant 0 : i32
    %c0_i32_1 = arith.constant 0 : i32
    return %c0_i32, %c0_i32_0 : i32, i32
  }
  func.func @transform_3(%arg0: i32, %arg1: i32) -> (i32, i32) {
    %c0_i32 = arith.constant 0 : i32
    %c0_i32_0 = arith.constant 0 : i32
    %c0_i32_1 = arith.constant 0 : i32
    return %c0_i32, %c0_i32_0 : i32, i32
  }
  func.func @transform_4(%arg0: i32, %arg1: i32) -> (i32, i32) {
    %c0_i32 = arith.constant 0 : i32
    %c0_i32_0 = arith.constant 0 : i32
    %c0_i32_1 = arith.constant 0 : i32
    return %c0_i32, %c0_i32_0 : i32, i32
  }
  func.func @transform_5(%arg0: i32, %arg1: i32) -> (i32, i32) {
    %c0_i32 = arith.constant 0 : i32
    %c0_i32_0 = arith.constant 0 : i32
    %c0_i32_1 = arith.constant 0 : i32
    return %c0_i32, %c0_i32_0 : i32, i32
  }
  func.func @transform_6(%arg0: i32, %arg1: i32) -> (i32, i32) {
    %c0_i32 = arith.constant 0 : i32
    %c0_i32_0 = arith.constant 0 : i32
    %c0_i32_1 = arith.constant 0 : i32
    return %c0_i32, %c0_i32_0 : i32, i32
  }
  func.func @transform_7(%arg0: i32, %arg1: i32) -> (i32, i32) {
    %c0_i32 = arith.constant 0 : i32
    %c0_i32_0 = arith.constant 0 : i32
    %c0_i32_1 = arith.constant 0 : i32
    return %c0_i32, %c0_i32_0 : i32, i32
  }
  func.func @transform_8(%arg0: i32, %arg1: i32) -> (i32, i32) {
    %c0_i32 = arith.constant 0 : i32
    %c0_i32_0 = arith.constant 0 : i32
    %c0_i32_1 = arith.constant 0 : i32
    return %c0_i32, %c0_i32_0 : i32, i32
  }
  func.func @transform_9(%arg0: i32, %arg1: i32) -> (i32, i32) {
    %c0_i32 = arith.constant 0 : i32
    %c0_i32_0 = arith.constant 0 : i32
    return %arg0, %c0_i32 : i32, i32
  }
}

</mosaic_0001>

<bundles_post_ra>
// kernel: tpu_custom_call.1
= control target key start
LH: loop header
LB: loop body
LE: loop exit
PB: predicated region body
PF: predicated region fallthrough
CT: control target
= control target key end

     0   :  { %14 = vsyncpa [#allocation4], 0  ;;  %s1680_s0 = inlined_call_operand.vmem [shape: f32[8,1024], index: 0, kind: input, shape index: {}]   ;;  %s1681_s1 = inlined_call_operand.hbm [shape: bf16[1024,128], index: 1, kind: input, shape index: {}]   ;;  %s1682_s2 = inlined_call_operand.vmem [shape: f32[1,128], index: 2, kind: input, shape index: {}]   ;;  %s1683_s3 = inlined_call_operand.vmem [shape: bf16[128,32], index: 3, kind: input, shape index: {}]   ;;  %s1684_s4 = inlined_call_operand.vmem [shape: f32[1,32], index: 4, kind: input, shape index: {}]   ;;  %s1685_s5 = inlined_call_operand.vmem [shape: bf16[32,64], index: 5, kind: input, shape index: {}]   ;;  %s1686_s6 = inlined_call_operand.vmem [shape: f32[1,64], index: 6, kind: input, shape index: {}]   ;;  %s1687_s7 = inlined_call_operand.hbm [shape: f32[64,128], index: 7, kind: input, shape index: {}]   ;;  %s1688_s8 = inlined_call_operand.vmem [shape: f32[1,128], index: 8, kind: input, shape index: {}]   ;;  %s1689_s9 = inlined_call_operand.hbm [shape: f32[8,128], index: 9, kind: output, shape index: {}]  }
   0x1   :  { %15 = vsyncpa [#allocation7], 0 }
   0x2   :  { %16 = vsyncpa [#allocation5], 0  ;;  %s1497_s30 = smov [#allocation3]   ;;  %s1425_s13 = scalar_lea.hbm %s1681_s1, 8192 }
   0x3   :  { %s24_s10 = sshll.u32 %s1497_s30, 4  ;;  %p1426_p0 = scmp.ne.s32.totalorder %s1681_s1, %s1425_s13  ;;  %s25_s10 = int_to_ptr.vmem [resolvable:$true] %s24_s10 }
   0x4   :  { %p1429_p1 = scmp.lt.u32.totalorder %s1425_s13, %s1681_s1 }
   0x6   :  { %p1431_p2 = pnand %p1429_p1, %p1426_p0 }
   0x8   :  { %1434 = shalt.err (!%p1431_p2)
}
   0x9   :  { %s1435_s18 = scalar_lea.vmem %s25_s10, 8192  ;;  %p1440_p4 = scmp.lt.s32.totalorder %s25_s10, %s25_s10 }
   0xa   :  { %p1436_p3 = scmp.ne.s32.totalorder %s25_s10, %s1435_s18  ;;  %p1441_p5 = scmp.lt.s32.totalorder %s1435_s18, %s1435_s18 }
   0xc   :  { %p1442_p6 = por %p1441_p5, %p1440_p4 }
   0xe   :  { %p1443_p7 = pnand %p1442_p6, %p1436_p3 }
  0x10   :  { %1446 = shalt.err (!%p1443_p7)
}
  0x11   :  { %s1498_s19 = smov 64   ;;  %s1499_s20 = smov 4  }
  0x12   :  { %30 = dma.hbm_to_vmem [thread:$0]  %s1681_s1, 8192, %s25_s10, [#allocation4], %s1498_s19, %s1498_s19, %s1499_s20  }
  0x13   :  { %s1500_s23 = smov [#allocation6]   ;;  %s1447_s27 = scalar_lea.hbm %s1687_s7, 1024 }
  0x14   :  { %s46_s24 = sshll.u32 %s1500_s23, 4  ;;  %p1448_p8 = scmp.ne.s32.totalorder %s1687_s7, %s1447_s27  ;;  %s47_s24 = int_to_ptr.vmem [resolvable:$true] %s46_s24 }
  0x15   :  { %p1451_p9 = scmp.lt.u32.totalorder %s1447_s27, %s1687_s7 }
  0x17   :  { %p1453_p10 = pnand %p1451_p9, %p1448_p8 }
  0x19   :  { %1456 = shalt.err (!%p1453_p10)
}
  0x1a   :  { %s1457_s12 = scalar_lea.vmem %s47_s24, 1024  ;;  %p1462_p12 = scmp.lt.s32.totalorder %s47_s24, %s47_s24 }
  0x1b   :  { %p1458_p11 = scmp.ne.s32.totalorder %s47_s24, %s1457_s12  ;;  %p1463_p13 = scmp.lt.s32.totalorder %s1457_s12, %s1457_s12 }
  0x1d   :  { %p1464_p0 = por %p1463_p13, %p1462_p12 }
  0x1f   :  { %p1465_p1 = pnand %p1464_p0, %p1458_p11 }
  0x21   :  { %1468 = shalt.err (!%p1465_p1)
}
  0x22   :  { %s1501_s1 = smov 128   ;;  %s1502_s10 = smov 8  }
  0x23   :  { %52 = dma.hbm_to_vmem [thread:$0]  %s1687_s7, 1024, %s47_s24, [#allocation7], %s1501_s1, %s1501_s1, %s1502_s10  }
  0x24   :  { %1491 = dma.done.wait [#allocation4], 8192  }
  0x25   :  { %1492 = vsyncadd [#allocation4], 4294959104 }
  0x26   :  { %1493 = dma.done.wait [#allocation7], 1024  }
  0x27   :  { %1494 = vsyncadd [#allocation7], 4294966272  ;;  %v1339_v0 = vld [vmem:[#allocation3 + $0x40] sm:$0xff]   ;;  %v1343_v4 = vld [vmem:[#allocation3 + $0x48] sm:$0xff]   ;;  %vm1504_vm0 = vmmov 0   ;;  %vm920_vm1 = vcmask 261120  }
  0x28   :  { %v1340_v1 = vld [vmem:[#allocation3 + $0xc0] sm:$0xff]   ;;  %1161 = vmatprep.subr.bf16.mxu0 %v1339_v0  ;;  %v1344_v5 = vld [vmem:[#allocation3 + $0xc8] sm:$0xff]   ;;  %v1347_v8 = vld [vmem:[#allocation3 + $0x50] sm:$0xff]   ;;  %vm986_vm2 = vcmask 523264  }
  0x29   :  { %v1341_v2 = vld [vmem:[#allocation3] sm:$0xff]   ;;  %1183 = vmatprep.subr.bf16.mxu1 %v1340_v1  ;;  %v1345_v6 = vld [vmem:[#allocation3 + $0x8] sm:$0xff]   ;;  %v1348_v9 = vld [vmem:[#allocation3 + $0xd0] sm:$0xff]  }
  0x2a   :  { %v1342_v3 = vld [vmem:[#allocation3 + $0x80] sm:$0xff]   ;;  %1162 = vmatpush3.bf16.msra.mxu0 %v1341_v2  ;;  %v1346_v7 = vld [vmem:[#allocation3 + $0x88] sm:$0xff]   ;;  %v1349_v10 = vld [vmem:[#allocation3 + $0x10] sm:$0xff]  }
  0x2b   :  { %1184 = vmatpush3.bf16.msra.mxu1 %v1342_v3  ;;  %1163 = vmatprep.subr.bf16.mxu0 %v1343_v4  ;;  %v1350_v11 = vld [vmem:[#allocation3 + $0x90] sm:$0xff]   ;;  %v1351_v12 = vld [vmem:[#allocation3 + $0x58] sm:$0xff]   ;;  %v1355_v16 = vld [vmem:[#allocation3 + $0x60] sm:$0xff]  }
  0x2c   :  { %1185 = vmatprep.subr.bf16.mxu1 %v1344_v5  ;;  %v1352_v13 = vld [vmem:[#allocation3 + $0xd8] sm:$0xff]   ;;  %v1356_v17 = vld [vmem:[#allocation3 + $0xe0] sm:$0xff]   ;;  %v1359_v20 = vld [vmem:[#allocation3 + $0x68] sm:$0xff]  }
  0x2d   :  { %v1353_v14 = vld [vmem:[#allocation3 + $0x18] sm:$0xff]   ;;  %v1357_v18 = vld [vmem:[#allocation3 + $0x20] sm:$0xff]   ;;  %v1360_v21 = vld [vmem:[#allocation3 + $0xe8] sm:$0xff]  }
  0x2e   :  { %1164 = vmatpush3.bf16.msra.mxu0 %v1345_v6  ;;  %v1354_v15 = vld [vmem:[#allocation3 + $0x98] sm:$0xff]   ;;  %v1358_v19 = vld [vmem:[#allocation3 + $0xa0] sm:$0xff]   ;;  %v1361_v22 = vld [vmem:[#allocation3 + $0x28] sm:$0xff]  }
  0x2f   :  { %1186 = vmatpush3.bf16.msra.mxu1 %v1346_v7  ;;  %1165 = vmatprep.subr.bf16.mxu0 %v1347_v8  ;;  %v1362_v23 = vld [vmem:[#allocation3 + $0xa8] sm:$0xff]   ;;  %v1363_v24 = vld [vmem:[#allocation3 + $0x70] sm:$0xff]   ;;  %v1367_v28 = vld [vmem:[#allocation3 + $0x78] sm:$0xff]  }
  0x30   :  { %1187 = vmatprep.subr.bf16.mxu1 %v1348_v9  ;;  %v1364_v25 = vld [vmem:[#allocation3 + $0xf0] sm:$0xff]   ;;  %v1368_v29 = vld [vmem:[#allocation3 + $0xf8] sm:$0xff]   ;;  %v69_v32 = vld [vmem:[%s1680_s0 + $0x8] sm:$0xff] }
  0x31   :  { %v1365_v26 = vld [vmem:[#allocation3 + $0x30] sm:$0xff]   ;;  %v1369_v30 = vld [vmem:[#allocation3 + $0x38] sm:$0xff]   ;;  %v68_v34 = vld [vmem:[%s1680_s0] sm:$0xff]  ;;  %v77_v35 = vpack.c.bf16 %v69_v32, %v69_v32 }
  0x32   :  { %1166 = vmatpush3.bf16.msra.mxu0 %v1349_v10  ;;  %v1366_v27 = vld [vmem:[#allocation3 + $0xb0] sm:$0xff]   ;;  %v1370_v31 = vld [vmem:[#allocation3 + $0xb8] sm:$0xff]   ;;  %v76_v37 = vpack.c.bf16 %v68_v34, %v68_v34  ;;  %v1371_v40 = vld [vmem:[#allocation3 + $0x140] sm:$0xff]  }
  0x33   :  { %1188 = vmatpush3.bf16.msra.mxu1 %v1350_v11  ;;  %1167 = vmatprep.subr.bf16.mxu0 %v1351_v12  ;;  %v71_v33 = vld [vmem:[%s1680_s0 + $0x18] sm:$0xff]  ;;  %v70_v38 = vld [vmem:[%s1680_s0 + $0x10] sm:$0xff]  ;;  %v1372_v41 = vld [vmem:[#allocation3 + $0x1c0] sm:$0xff]  }
  0x34   :  { %1189 = vmatprep.subr.bf16.mxu1 %v1352_v13  ;;  %v79_v36 = vpack.c.bf16 %v71_v33, %v71_v33  ;;  %v78_v39 = vpack.c.bf16 %v70_v38, %v70_v38  ;;  %628 = vmatprep.mubr.bf16.mxu0 %v77_v35  ;;  %v1373_v42 = vld [vmem:[#allocation3 + $0x100] sm:$0xff]   ;;  %v1375_v44 = vld [vmem:[#allocation3 + $0x148] sm:$0xff]   ;;  %v1379_v48 = vld [vmem:[#allocation3 + $0x150] sm:$0xff]  }
  0x35   :  { %v1374_v43 = vld [vmem:[#allocation3 + $0x180] sm:$0xff]   ;;  %v1376_v45 = vld [vmem:[#allocation3 + $0x1c8] sm:$0xff]   ;;  %v1380_v49 = vld [vmem:[#allocation3 + $0x1d0] sm:$0xff]  }
  0x36   :  { %1168 = vmatpush3.bf16.msra.mxu0 %v1353_v14  ;;  %668 = vmatprep.mubr.bf16.mxu1 %v79_v36  ;;  %v1377_v46 = vld [vmem:[#allocation3 + $0x108] sm:$0xff]   ;;  %v1381_v50 = vld [vmem:[#allocation3 + $0x110] sm:$0xff]   ;;  %v1383_v52 = vld [vmem:[#allocation3 + $0x158] sm:$0xff]  }
  0x37   :  { %1190 = vmatpush3.bf16.msra.mxu1 %v1354_v15  ;;  %1169 = vmatprep.subr.bf16.mxu0 %v1355_v16  ;;  %v1378_v47 = vld [vmem:[#allocation3 + $0x188] sm:$0xff]   ;;  %v1382_v51 = vld [vmem:[#allocation3 + $0x190] sm:$0xff]   ;;  %v1384_v53 = vld [vmem:[#allocation3 + $0x1d8] sm:$0xff]  }
  0x38   :  { %1191 = vmatprep.subr.bf16.mxu1 %v1356_v17  ;;  %v1385_v54 = vld [vmem:[#allocation3 + $0x118] sm:$0xff]   ;;  %v1387_v56 = vld [vmem:[#allocation3 + $0x160] sm:$0xff]   ;;  %v1391_v60 = vld [vmem:[#allocation3 + $0x168] sm:$0xff]   ;;  %v1503_v17 = vmov 0.0  }
  0x39   :  { %v1386_v55 = vld [vmem:[#allocation3 + $0x198] sm:$0xff]   ;;  %v1388_v57 = vld [vmem:[#allocation3 + $0x1e0] sm:$0xff]   ;;  %v1392_v61 = vld [vmem:[#allocation3 + $0x1e8] sm:$0xff]  }
  0x3a   :  { %1170 = vmatpush3.bf16.msra.mxu0 %v1357_v18  ;;  %v1389_v58 = vld [vmem:[#allocation3 + $0x120] sm:$0xff]   ;;  %v1393_v62 = vld [vmem:[#allocation3 + $0x128] sm:$0xff]   ;;  %v1395_v0 = vld [vmem:[#allocation3 + $0x170] sm:$0xff]  }
  0x3b   :  { %1192 = vmatpush3.bf16.msra.mxu1 %v1358_v19  ;;  %1171 = vmatprep.subr.bf16.mxu0 %v1359_v20  ;;  %v1390_v59 = vld [vmem:[#allocation3 + $0x1a0] sm:$0xff]   ;;  %v1394_v63 = vld [vmem:[#allocation3 + $0x1a8] sm:$0xff]   ;;  %v1396_v1 = vld [vmem:[#allocation3 + $0x1f0] sm:$0xff]  }
  0x3c   :  { %1193 = vmatprep.subr.bf16.mxu1 %v1360_v21  ;;  %v1397_v2 = vld [vmem:[#allocation3 + $0x130] sm:$0xff]   ;;  %v1399_v4 = vld [vmem:[#allocation3 + $0x178] sm:$0xff]   ;;  %v73_v8 = vld [vmem:[%s1680_s0 + $0x28] sm:$0xff] }
  0x3d   :  { %v1398_v3 = vld [vmem:[#allocation3 + $0x1b0] sm:$0xff]   ;;  %v1400_v5 = vld [vmem:[#allocation3 + $0x1f8] sm:$0xff]   ;;  %v81_v10 = vpack.c.bf16 %v73_v8, %v73_v8  ;;  %v72_v12 = vld [vmem:[%s1680_s0 + $0x20] sm:$0xff] }
  0x3e   :  { %1172 = vmatpush3.bf16.msra.mxu0 %v1361_v22  ;;  %v1401_v6 = vld [vmem:[#allocation3 + $0x138] sm:$0xff]   ;;  %v74_v13 = vld [vmem:[%s1680_s0 + $0x30] sm:$0xff]  ;;  %v80_v14 = vpack.c.bf16 %v72_v12, %v72_v12  ;;  %v1403_v16 = vld [vmem:[%s1683_s3] sm:$0xff]  }
  0x3f   :  { %1194 = vmatpush3.bf16.msra.mxu1 %v1362_v23  ;;  %1173 = vmatprep.subr.bf16.mxu0 %v1363_v24  ;;  %v1402_v7 = vld [vmem:[#allocation3 + $0x1b8] sm:$0xff]   ;;  %v82_v15 = vpack.c.bf16 %v74_v13, %v74_v13  ;;  %v1404_v18 = vld [vmem:[%s1683_s3 + $0x8] sm:$0xff]   ;;  %v1405_v19 = vld [vmem:[%s1683_s3 + $0x10] sm:$0xff]  }
  0x40   :  { %1195 = vmatprep.subr.bf16.mxu1 %v1364_v25  ;;  %v75_v9 = vld [vmem:[%s1680_s0 + $0x38] sm:$0xff]  ;;  %v1407_v21 = vld [vmem:[%s1683_s3 + $0x20] sm:$0xff]   ;;  %v1408_v22 = vld [vmem:[%s1683_s3 + $0x28] sm:$0xff]  }
  0x41   :  { %v83_v11 = vpack.c.bf16 %v75_v9, %v75_v9  ;;  %v1406_v20 = vld [vmem:[%s1683_s3 + $0x18] sm:$0xff]   ;;  %v1409_v23 = vld [vmem:[%s1683_s3 + $0x30] sm:$0xff]   ;;  %v1505_v9 = vmov 0.0|0.0   ;;  %v975_v13 = vld [vmem:[#allocation6 + $0x20] sm:$0xff] }
  0x42   :  { %1174 = vmatpush3.bf16.msra.mxu0 %v1365_v26  ;;  %v1410_v24 = vld [vmem:[%s1683_s3 + $0x38] sm:$0xff]  }
  0x43   :  { %1196 = vmatpush3.bf16.msra.mxu1 %v1366_v27  ;;  %1175 = vmatprep.subr.bf16.mxu0 %v1367_v28 }
  0x44   :  { %1197 = vmatprep.subr.bf16.mxu1 %v1368_v29 }
  0x46   :  { %1176 = vmatpush3.bf16.msra.mxu0 %v1369_v30 }
  0x47   :  { %1198 = vmatpush3.bf16.msra.mxu1 %v1370_v31  ;;  %1205 = vmatprep.subr.bf16.mxu0 %v1371_v40 }
  0x48   :  { %1227 = vmatprep.subr.bf16.mxu1 %v1372_v41 }
  0x49   :  { %629 = vmatmul.mubr.bf16.vlgmr.msra.gmra.mrb[0].mxu0 %v76_v37 }
  0x4a   :  { %669 = vmatmul.mubr.bf16.vlgmr.msra.gmra.mrb[0].mxu1 %v78_v39  ;;  %1206 = vmatpush3.bf16.msra.mxu0 %v1373_v42 }
  0x4b   :  { %1228 = vmatpush3.bf16.msra.mxu1 %v1374_v43  ;;  %1207 = vmatprep.subr.bf16.mxu0 %v1375_v44 }
  0x4c   :  { %1229 = vmatprep.subr.bf16.mxu1 %v1376_v45  ;;  %708 = vmatprep.mubr.bf16.mxu0 %v81_v10  ;;  %v973_v10 = vld [vmem:[#allocation6 + $0x10] sm:$0xff] }
  0x4d   :  { %748 = vmatprep.mubr.bf16.mxu1 %v83_v11  ;;  %v974_v11 = vld [vmem:[#allocation6 + $0x18] sm:$0xff] }
  0x4e   :  { %1208 = vmatpush3.bf16.msra.mxu0 %v1377_v46  ;;  %v1321_v12 = vpack.c.bf16 %v974_v11, %v973_v10 }
  0x4f   :  { %1230 = vmatpush3.bf16.msra.mxu1 %v1378_v47  ;;  %1209 = vmatprep.subr.bf16.mxu0 %v1379_v48  ;;  %v1142_v47 = vld [vmem:[%s1682_s2] ss:$0 sm:$0xff] }
  0x50   :  { %1231 = vmatprep.subr.bf16.mxu1 %v1380_v49 }
  0x52   :  { %1210 = vmatpush3.bf16.msra.mxu0 %v1381_v50 }
  0x53   :  { %1232 = vmatpush3.bf16.msra.mxu1 %v1382_v51  ;;  %1211 = vmatprep.subr.bf16.mxu0 %v1383_v52 }
  0x54   :  { %1233 = vmatprep.subr.bf16.mxu1 %v1384_v53 }
  0x56   :  { %1212 = vmatpush3.bf16.msra.mxu0 %v1385_v54 }
  0x57   :  { %1234 = vmatpush3.bf16.msra.mxu1 %v1386_v55  ;;  %1213 = vmatprep.subr.bf16.mxu0 %v1387_v56  ;;  %v1411_v56 = vld [vmem:[%s1685_s5] sm:$0xff]  }
  0x58   :  { %1235 = vmatprep.subr.bf16.mxu1 %v1388_v57  ;;  %v1412_v57 = vld [vmem:[%s1685_s5 + $0x8] sm:$0xff]  }
  0x5a   :  { %1214 = vmatpush3.bf16.msra.mxu0 %v1389_v58  ;;  %v1144_v58 = vld [vmem:[%s1684_s4] ss:$0 sm:$0xff] }
  0x5b   :  { %1236 = vmatpush3.bf16.msra.mxu1 %v1390_v59  ;;  %1215 = vmatprep.subr.bf16.mxu0 %v1391_v60 }
  0x5c   :  { %1237 = vmatprep.subr.bf16.mxu1 %v1392_v61 }
  0x5e   :  { %1216 = vmatpush3.bf16.msra.mxu0 %v1393_v62 }
  0x5f   :  { %1238 = vmatpush3.bf16.msra.mxu1 %v1394_v63  ;;  %1217 = vmatprep.subr.bf16.mxu0 %v1395_v0 }
  0x60   :  { %1239 = vmatprep.subr.bf16.mxu1 %v1396_v1 }
  0x62   :  { %1218 = vmatpush3.bf16.msra.mxu0 %v1397_v2 }
  0x63   :  { %1240 = vmatpush3.bf16.msra.mxu1 %v1398_v3  ;;  %1219 = vmatprep.subr.bf16.mxu0 %v1399_v4 }
  0x64   :  { %1241 = vmatprep.subr.bf16.mxu1 %v1400_v5 }
  0x66   :  { %1220 = vmatpush3.bf16.msra.mxu0 %v1401_v6  ;;  %v971_v6 = vld [vmem:[#allocation6] sm:$0xff] }
  0x67   :  { %1242 = vmatpush3.bf16.msra.mxu1 %v1402_v7  ;;  %1270 = vmatprep.subr.bf16.mxu0 %v1503_v17  ;;  %v972_v7 = vld [vmem:[#allocation6 + $0x8] sm:$0xff] }
  0x68   :  { %1290 = vmatprep.subr.bf16.mxu1 %v1503_v17  ;;  %v1318_v8 = vpack.c.bf16 %v972_v7, %v971_v6 }
  0x69   :  { %709 = vmatmul.mubr.bf16.vlgmr.msra.gmra.mrb[4].mxu0 %v80_v14  ;;  %v976_v14 = vld [vmem:[#allocation6 + $0x28] sm:$0xff] }
  0x6a   :  { %749 = vmatmul.mubr.bf16.vlgmr.msra.gmra.mrb[4].mxu1 %v82_v15  ;;  %1271 = vmatpush3.bf16.msra.mxu0 %v1403_v16  ;;  %v1324_v15 = vpack.c.bf16 %v976_v14, %v975_v13  ;;  %v977_v16 = vld [vmem:[#allocation6 + $0x30] sm:$0xff] }
  0x6b   :  { %1272 = vmatprep.subr.bf16.mxu0 %v1503_v17  ;;  %1286 = vmatprep.mubr.msk.bf16.mxu0 %vm1504_vm0, %v1503_v17 }
  0x6c   :  { %1294 = vmatprep.mubr.msk.bf16.mxu1 %vm1504_vm0, %v1503_v17  ;;  %1291 = vmatpush3.bf16.msra.mxu1 %v1411_v56 }
  0x6d   :  { %1292 = vmatprep.subr.bf16.mxu1 %v1503_v17 }
  0x6e   :  { %1273 = vmatpush3.bf16.msra.mxu0 %v1404_v18  ;;  %v978_v18 = vld [vmem:[#allocation6 + $0x38] sm:$0xff] }
  0x6f   :  { %1274 = vmatprep.subr.bf16.mxu0 %v1503_v17 }
  0x70   :  { %1293 = vmatpush3.bf16.msra.mxu1 %v1412_v57 }
  0x71   :  { %1317 = vmatprep.subr.bf16.mxu1 %v1505_v9 }
  0x72   :  { %1275 = vmatpush3.bf16.msra.mxu0 %v1405_v19  ;;  %v1154_v19 = vld [vmem:[%s1686_s6] ss:$0 sm:$0xff]  ;;  %s1506_s6 = smov [#allocation8]  }
  0x73   :  { %1276 = vmatprep.subr.bf16.mxu0 %v1503_v17  ;;  %s1068_s30 = sshll.u32 %s1506_s6, 4  ;;  %s1069_s30 = int_to_ptr.vmem [resolvable:$true] %s1068_s30 }
  0x74   :  { %s1469_s11 = scalar_lea.vmem %s1069_s30, 128  ;;  %p1474_p3 = scmp.lt.s32.totalorder %s1069_s30, %s1069_s30 }
  0x75   :  { %p1470_p2 = scmp.ne.s32.totalorder %s1069_s30, %s1469_s11  ;;  %p1475_p4 = scmp.lt.s32.totalorder %s1469_s11, %s1469_s11 }
  0x76   :  { %1277 = vmatpush3.bf16.msra.mxu0 %v1406_v20 }
  0x77   :  { %1278 = vmatprep.subr.bf16.mxu0 %v1503_v17  ;;  %p1476_p5 = por %p1475_p4, %p1474_p3 }
  0x79   :  { %p1477_p6 = pnand %p1476_p5, %p1470_p2 }
  0x7a   :  { %1279 = vmatpush3.bf16.msra.mxu0 %v1407_v21 }
  0x7b   :  { %1280 = vmatprep.subr.bf16.mxu0 %v1503_v17 }
  0x7e   :  { %1281 = vmatpush3.bf16.msra.mxu0 %v1408_v22 }
  0x7f   :  { %1282 = vmatprep.subr.bf16.mxu0 %v1503_v17 }
  0x82   :  { %1283 = vmatpush3.bf16.msra.mxu0 %v1409_v23 }
  0x83   :  { %1284 = vmatprep.subr.bf16.mxu0 %v1503_v17 }
  0x86   :  { %1285 = vmatpush3.bf16.msra.mxu0 %v1410_v24 }
 0x11c   :  { %v1177_v25 = vpop.f32.mrb[0].mxu0 }
 0x11d   :  { %v1199_v26 = vpop.f32.mrb[0].mxu1  ;;  %v1178_v27 = vpop.f32.mrb[1].mxu0 }
 0x11e   :  { %v1200_v28 = vpop.f32.mrb[1].mxu1  ;;  %v1179_v29 = vadd.f32 %v1178_v27, %v1177_v25  ;;  %v1180_v31 = vpop.f32.mrb[2].mxu0 }
 0x11f   :  { %v1201_v30 = vadd.f32 %v1200_v28, %v1199_v26  ;;  %v1202_v32 = vpop.f32.mrb[2].mxu1  ;;  %v1181_v33 = vpop.f32.mrb[3].mxu0 }
 0x120   :  { %v1203_v34 = vpop.f32.mrb[3].mxu1 }
 0x121   :  { %v671_v35 = vadd.f32 %v1201_v30, %v1179_v29  ;;  %v1159_v30 = vld [vmem:[%s1688_s8] ss:$0 sm:$0xff] }
 0x13c   :  { %v1221_v36 = vpop.f32.mrb[4].mxu0 }
 0x13d   :  { %v1243_v37 = vpop.f32.mrb[4].mxu1  ;;  %v1222_v38 = vpop.f32.mrb[5].mxu0 }
 0x13e   :  { %v1223_v39 = vadd.f32 %v1222_v38, %v1221_v36  ;;  %v1244_v40 = vpop.f32.mrb[5].mxu1  ;;  %v1224_v41 = vpop.f32.mrb[6].mxu0 }
 0x13f   :  { %v1245_v42 = vadd.f32 %v1244_v40, %v1243_v37  ;;  %v1246_v43 = vpop.f32.mrb[6].mxu1  ;;  %v1225_v44 = vpop.f32.mrb[7].mxu0 }
 0x140   :  { %v711_v45 = vadd.f32 %v1223_v39, %v671_v35  ;;  %v1247_v46 = vpop.f32.mrb[7].mxu1 }
 0x142   :  { %v751_v48 = vadd.f32 %v1245_v42, %v711_v45 }
 0x144   :  { %v769_v49 = vadd.f32 %v1142_v47, %v751_v48 }
 0x146   :  { %v1143_v50 = vmul.f32 -1.442695, %v769_v49 }
 0x148   :  { %1413 = vpow2.f32 %v1143_v50 }
 0x152   :  { %v1414_v51 = vpop.eup %1413 }
 0x153   :  { %v773_v52 = vadd.f32 1.0, %v1414_v51 }
 0x155   :  { %1415 = vrcp.f32 %v773_v52 }
 0x15f   :  { %v1416_v53 = vpop.eup %1415 }
 0x160   :  { %v1645_v54 = vmul.f32 %v1416_v53, %v769_v49 }
 0x162   :  { %v777_v55 = vpack.c.bf16 %v1645_v54, %v1645_v54 }
 0x164   :  { %1287 = vmatmul.mubr.bf16.vlgmr.msra.gmra.mrb[8].mxu0 %v777_v55 }
 0x237   :  { %v883_v59 = vpop.f32.mrb[8].mxu0 }
 0x238   :  { %v884_v60 = vadd.f32 %v1144_v58, %v883_v59  ;;  %v1288_v61 = vpop.f32.mrb[9].mxu0 }
 0x239   :  { %v886_v62 = vpop.f32.mrb[10].mxu0 }
 0x23a   :  { %v1153_v63 = vmul.f32 -1.442695, %v884_v60  ;;  %v1289_v0 = vpop.f32.mrb[11].mxu0 }
 0x23c   :  { %1417 = vpow2.f32 %v1153_v63 }
 0x246   :  { %v1418_v1 = vpop.eup %1417 }
 0x247   :  { %v892_v2 = vadd.f32 1.0, %v1418_v1 }
 0x249   :  { %1419 = vrcp.f32 %v892_v2 }
 0x253   :  { %v1420_v3 = vpop.eup %1419 }
 0x254   :  { %v895_v4 = vmul.f32 %v1420_v3, %v884_v60 }
 0x256   :  { %v896_v5 = vpack.c.bf16 %v895_v4, %v895_v4 }
 0x258   :  { %1295 = vmatmul.mubr.msk.bf16.vlgmr.msra.gmra.mrb[8].mxu1 %vm920_vm1, %v896_v5 }
 0x259   :  { %1314 = vmatprep.mubr.msk.f32.mxu1 %vm1504_vm0, %v1503_v17  ;;  %1319 = vmatpush3.bf16.msra.mxu1 %v1318_v8  ;;  %v1327_v17 = vpack.c.bf16 %v978_v18, %v977_v16 }
 0x25a   :  { %1320 = vmatprep.subr.bf16.mxu1 %v1505_v9 }
 0x25d   :  { %1322 = vmatpush3.bf16.msra.mxu1 %v1321_v12 }
 0x25e   :  { %1323 = vmatprep.subr.bf16.mxu1 %v1505_v9 }
 0x261   :  { %1325 = vmatpush3.bf16.msra.mxu1 %v1324_v15 }
 0x262   :  { %1326 = vmatprep.subr.bf16.mxu1 %v1505_v9 }
 0x265   :  { %1328 = vmatpush3.bf16.msra.mxu1 %v1327_v17 }
 0x32b   :  { %v958_v20 = vpop.f32.mrb[8].mxu1 }
 0x32c   :  { %v959_v21 = vadd.f32 %v1154_v19, %v958_v20  ;;  %v1296_v22 = vpop.f32.mrb[9].mxu1 }
 0x32d   :  { %v961_v23 = vpop.f32.mrb[10].mxu1 }
 0x32e   :  { %v1158_v24 = vmul.f32 -1.442695, %v959_v21  ;;  %v1297_v25 = vpop.f32.mrb[11].mxu1 }
 0x330   :  { %1421 = vpow2.f32 %v1158_v24 }
 0x33a   :  { %v1422_v26 = vpop.eup %1421 }
 0x33b   :  { %v967_v27 = vadd.f32 1.0, %v1422_v26 }
 0x33d   :  { %1423 = vrcp.f32 %v967_v27 }
 0x347   :  { %v1424_v28 = vpop.eup %1423 }
 0x348   :  { %v970_v29 = vmul.f32 %v1424_v28, %v959_v21 }
 0x34a   :  { %1315 = vmatmul.mubr.msk.f32.vlgmr.msra.gmra.mrb[12].mxu1 %vm986_vm2, %v970_v29 }
 0x41d   :  { %v1056_v31 = vpop.f32.mrb[12].mxu1 }
 0x41e   :  { %v1057_v32 = vadd.f32 %v1159_v30, %v1056_v31  ;;  %v1316_v33 = vpop.f32.mrb[13].mxu1 }
 0x420   :  { %v1060_v34 = vadd.f32 %v1057_v32, %v1645_v54 }
 0x422   :  { %1061 = vst [vmem:[#allocation8] sm:$0xff] %v1060_v34 }
 0x423   :  { %1480 = shalt.err (!%p1477_p6)
}
 0x424   :  { %s1481_s8 = scalar_lea.hbm %s1689_s9, 128 }
 0x425   :  { %p1482_p7 = scmp.ne.s32.totalorder %s1689_s9, %s1481_s8  ;;  %p1485_p8 = scmp.lt.u32.totalorder %s1481_s8, %s1689_s9 }
 0x427   :  { %p1487_p9 = pnand %p1485_p8, %p1482_p7 }
 0x429   :  { %1490 = shalt.err (!%p1487_p9)
}
 0x42a   :  { %1071 = dma.vmem_to_hbm [thread:$0]  %s1069_s30, 128, %s1689_s9, [#allocation5]  }
 0x42b   :  { %1495 = dma.done.wait [#allocation5], 128  }
 0x42c   :  { %1496 = vsyncadd [#allocation5], 4294967168 }
 0x42d   :  { %1075 = vsyncpa [#allocation4], 1 }
 0x42e   :  { %1076 = vsyncpa [#allocation7], 1 }
 0x42f   :  { %1077 = vsyncpa [#allocation5], 1 }

</bundles_post_ra>
